<compile_context>
chip_gen: v5e
topology: v5e:2x2
jax: 0.10.0
libtpu: 0.0.40
codegen_flags: <defaults>
</compile_context>

<pallas_src>
import jax
import jax.numpy as jnp
from jax.experimental import pallas as pl
from jax.experimental.pallas import tpu as pltpu

NB_STATE_VAR = 18    # ANM6Easy state_N
NB_ACTION_VAR = 6    # ANM6Easy action_space.shape[0]
HIDDEN = 512


def _round_up(n, m):
    return ((n + m - 1) // m) * m


def rf_cont_kernel(x_ref, w1_ref, b1_ref, w2_ref, b2_ref, w3_ref, b3_ref, o_ref):
    """Fused 3-layer MLP on one batch tile: relu(x@W1+b1) -> relu(.@W2+b2) -> .@W3+b3.

    Weights are bf16 (VMEM-resident across grid steps); accumulation is f32.
    """
    x = x_ref[...].astype(jnp.bfloat16)                               # (TB, 18)
    h1 = jnp.dot(x, w1_ref[...], preferred_element_type=jnp.float32) + b1_ref[...]
    h1 = jnp.maximum(h1, 0.0).astype(jnp.bfloat16)                    # (TB, 512)
    h2 = jnp.dot(h1, w2_ref[...], preferred_element_type=jnp.float32) + b2_ref[...]
    h2 = jnp.maximum(h2, 0.0).astype(jnp.bfloat16)                    # (TB, 512)
    o_ref[...] = (jnp.dot(h2, w3_ref[...], preferred_element_type=jnp.float32)
                  + b3_ref[...]).astype(o_ref.dtype)                  # (TB, 6)


def rf_cont_forward(x, params, *, batch_tile=256):
    """Run the fused MLP kernel.

    x: (B, NB_STATE_VAR) float32
    params: dict with w1 (18,512), b1 (1,512), w2 (512,512), b2 (1,512),
            w3 (512,6), b3 (1,6) — any float dtype; weights are cast to bf16.
    """
    B = x.shape[0]
    x = x.astype(jnp.float32)

    # Batch tile: multiple of 8 (sublane), default 256 to fill the MXU on
    # v6e/v7x (also a multiple of 128 for v5e); clamp down for tiny batches.
    TB = min(batch_tile, _round_up(B, 8))
    B_pad = _round_up(B, TB)
    if B_pad != B:
        x = jnp.pad(x, ((0, B_pad - B), (0, 0)))   # zero rows: harmless, sliced off below

    # bf16 dot operands, f32 biases.
    w1 = params["w1"].astype(jnp.bfloat16)
    w2 = params["w2"].astype(jnp.bfloat16)
    w3 = params["w3"].astype(jnp.bfloat16)
    b1 = params["b1"].astype(jnp.float32)
    b2 = params["b2"].astype(jnp.float32)
    b3 = params["b3"].astype(jnp.float32)

    grid = (pl.cdiv(B_pad, TB),)
    const = lambda i: (0, 0)   # weights/biases: same block every step -> stay resident

    flops = 2 * B_pad * (NB_STATE_VAR * HIDDEN + HIDDEN * HIDDEN + HIDDEN * NB_ACTION_VAR)
    bytes_accessed = (
        B_pad * NB_STATE_VAR * 4 + B_pad * NB_ACTION_VAR * 4          # x + out (f32)
        + 2 * (NB_STATE_VAR * HIDDEN + HIDDEN * HIDDEN + HIDDEN * NB_ACTION_VAR)  # bf16 W
        + 4 * (HIDDEN + HIDDEN + NB_ACTION_VAR)                        # f32 biases
    )

    out = pl.pallas_call(
        rf_cont_kernel,
        out_shape=jax.ShapeDtypeStruct((B_pad, NB_ACTION_VAR), jnp.float32),
        grid=grid,
        in_specs=[
            pl.BlockSpec((TB, NB_STATE_VAR), lambda i: (i, 0)),        # x: batch-tiled
            pl.BlockSpec((NB_STATE_VAR, HIDDEN), const),               # w1
            pl.BlockSpec((1, HIDDEN), const),                          # b1
            pl.BlockSpec((HIDDEN, HIDDEN), const),                     # w2
            pl.BlockSpec((1, HIDDEN), const),                          # b2
            pl.BlockSpec((HIDDEN, NB_ACTION_VAR), const),              # w3
            pl.BlockSpec((1, NB_ACTION_VAR), const),                   # b3
        ],
        out_specs=pl.BlockSpec((TB, NB_ACTION_VAR), lambda i: (i, 0)),
        compiler_params=pltpu.CompilerParams(
            dimension_semantics=("parallel",),                         # megacore on v7x
        ),
        cost_estimate=pl.CostEstimate(
            flops=flops, transcendentals=0, bytes_accessed=bytes_accessed),
    )(x, w1, b1, w2, b2, w3, b3)

    return out[:B]


def init_params(key):
    """Deterministic init mimicking PyTorch nn.Linear default:
    U(-1/sqrt(fan_in), 1/sqrt(fan_in)) for both weight and bias."""
    def linear(key, fan_in, fan_out):
        kw, kb = jax.random.split(key)
        bound = 1.0 / jnp.sqrt(jnp.float32(fan_in))
        w = jax.random.uniform(kw, (fan_in, fan_out), jnp.float32, -bound, bound)
        b = jax.random.uniform(kb, (1, fan_out), jnp.float32, -bound, bound)
        return w, b

    k1, k2, k3 = jax.random.split(key, 3)
    w1, b1 = linear(k1, NB_STATE_VAR, HIDDEN)
    w2, b2 = linear(k2, HIDDEN, HIDDEN)
    w3, b3 = linear(k3, HIDDEN, NB_ACTION_VAR)
    return {"w1": w1, "b1": b1, "w2": w2, "b2": b2, "w3": w3, "b3": b3}


def rf_cont_ref(x, p):
    """Pure-JAX reference matching the kernel's bf16-operand / f32-accumulate numerics."""
    bf = jnp.bfloat16
    h1 = jnp.maximum(
        jnp.dot(x.astype(bf), p["w1"].astype(bf), preferred_element_type=jnp.float32)
        + p["b1"], 0.0)
    h2 = jnp.maximum(
        jnp.dot(h1.astype(bf), p["w2"].astype(bf), preferred_element_type=jnp.float32)
        + p["b2"], 0.0)
    return (jnp.dot(h2.astype(bf), p["w3"].astype(bf), preferred_element_type=jnp.float32)
            + p["b3"])


if __name__ == "__main__":
    key = jax.random.PRNGKey(0)
    kx, kp = jax.random.split(key)

    B = 8
    x = jax.random.normal(kx, (B, NB_STATE_VAR), jnp.float32)
    params = init_params(kp)

    out = rf_cont_forward(x, params)
    out = jax.block_until_ready(out)

    ref = rf_cont_ref(x, params)
    assert out.shape == (B, NB_ACTION_VAR)
    assert jnp.allclose(out, ref, atol=1e-2, rtol=1e-2), "mismatch vs reference"

    # Also exercise a non-tile-multiple, larger batch to check grid + padding path.
    B2 = 300
    x2 = jax.random.normal(kx, (B2, NB_STATE_VAR), jnp.float32)
    out2 = jax.block_until_ready(rf_cont_forward(x2, params))
    ref2 = rf_cont_ref(x2, params)
    assert out2.shape == (B2, NB_ACTION_VAR)
    assert jnp.allclose(out2, ref2, atol=1e-2, rtol=1e-2), "mismatch vs reference (B=300)"

    print("KERNEL_OK")
</pallas_src>

<mosaic_0001>
module attributes {stable_mosaic.version = 11 : i64} {
  func.func @rf_cont_kernel(%arg0: i32, %arg1: memref<8x18xf32, #tpu.memory_space<vmem>>, %arg2: memref<18x512xbf16, #tpu.memory_space<vmem>>, %arg3: memref<1x512xf32, #tpu.memory_space<vmem>>, %arg4: memref<512x512xbf16, #tpu.memory_space<vmem>>, %arg5: memref<1x512xf32, #tpu.memory_space<vmem>>, %arg6: memref<512x6xbf16, #tpu.memory_space<vmem>>, %arg7: memref<1x6xf32, #tpu.memory_space<vmem>>, %arg8: memref<8x6xf32, #tpu.memory_space<vmem>>) attributes {dimension_semantics = [#tpu.dimension_semantics<parallel>], iteration_bounds = array<i64: 1>, scalar_prefetch = 0 : i64, scratch_operands = 0 : i64, tpu.core_type = #tpu.core_type<tc>, window_params = [{transform_indices = @transform_0, window_bounds = array<i64: 8, 18>}, {pipeline_mode = #tpu.pipeline_mode<synchronous>, transform_indices = @transform_1, window_bounds = array<i64: 18, 512>}, {pipeline_mode = #tpu.pipeline_mode<synchronous>, transform_indices = @transform_2, window_bounds = array<i64: 1, 512>}, {pipeline_mode = #tpu.pipeline_mode<synchronous>, transform_indices = @transform_3, window_bounds = array<i64: 512, 512>}, {pipeline_mode = #tpu.pipeline_mode<synchronous>, transform_indices = @transform_4, window_bounds = array<i64: 1, 512>}, {pipeline_mode = #tpu.pipeline_mode<synchronous>, transform_indices = @transform_5, window_bounds = array<i64: 512, 6>}, {pipeline_mode = #tpu.pipeline_mode<synchronous>, transform_indices = @transform_6, window_bounds = array<i64: 1, 6>}, {transform_indices = @transform_7, window_bounds = array<i64: 8, 6>}]} {
    %c0 = arith.constant 0 : index
    %c0_0 = arith.constant 0 : index
    %0 = vector.load %arg1[%c0, %c0_0] : memref<8x18xf32, #tpu.memory_space<vmem>>, vector<8x18xf32>
    %1 = arith.truncf %0 : vector<8x18xf32> to vector<8x18xbf16>
    %c0_1 = arith.constant 0 : index
    %c0_2 = arith.constant 0 : index
    %2 = vector.load %arg2[%c0_1, %c0_2] : memref<18x512xbf16, #tpu.memory_space<vmem>>, vector<18x512xbf16>
    %cst = arith.constant dense<0.000000e+00> : vector<8x512xf32>
    %3 = tpu.matmul %1, %2, %cst {dimension_numbers = #tpu.dot_dimension_numbers<[1], [0], [0], [1], [0, 0, 1, 1], [], []>} : vector<8x18xbf16>, vector<18x512xbf16>, vector<8x512xf32> -> vector<8x512xf32>
    %c0_3 = arith.constant 0 : index
    %c0_4 = arith.constant 0 : index
    %4 = vector.load %arg3[%c0_3, %c0_4] : memref<1x512xf32, #tpu.memory_space<vmem>>, vector<1x512xf32>
    %5 = vector.broadcast %4 : vector<1x512xf32> to vector<8x512xf32>
    %6 = arith.addf %3, %5 : vector<8x512xf32>
    %cst_5 = arith.constant 0.000000e+00 : f32
    %7 = vector.broadcast %cst_5 : f32 to vector<8x512xf32>
    %8 = arith.maximumf %6, %7 : vector<8x512xf32>
    %9 = arith.truncf %8 : vector<8x512xf32> to vector<8x512xbf16>
    %c0_6 = arith.constant 0 : index
    %c0_7 = arith.constant 0 : index
    %10 = vector.load %arg4[%c0_6, %c0_7] : memref<512x512xbf16, #tpu.memory_space<vmem>>, vector<512x512xbf16>
    %cst_8 = arith.constant dense<0.000000e+00> : vector<8x512xf32>
    %11 = tpu.matmul %9, %10, %cst_8 {dimension_numbers = #tpu.dot_dimension_numbers<[1], [0], [0], [1], [0, 0, 1, 1], [], []>} : vector<8x512xbf16>, vector<512x512xbf16>, vector<8x512xf32> -> vector<8x512xf32>
    %c0_9 = arith.constant 0 : index
    %c0_10 = arith.constant 0 : index
    %12 = vector.load %arg5[%c0_9, %c0_10] : memref<1x512xf32, #tpu.memory_space<vmem>>, vector<1x512xf32>
    %13 = vector.broadcast %12 : vector<1x512xf32> to vector<8x512xf32>
    %14 = arith.addf %11, %13 : vector<8x512xf32>
    %cst_11 = arith.constant 0.000000e+00 : f32
    %15 = vector.broadcast %cst_11 : f32 to vector<8x512xf32>
    %16 = arith.maximumf %14, %15 : vector<8x512xf32>
    %17 = arith.truncf %16 : vector<8x512xf32> to vector<8x512xbf16>
    %c0_12 = arith.constant 0 : index
    %c0_13 = arith.constant 0 : index
    %18 = vector.load %arg6[%c0_12, %c0_13] : memref<512x6xbf16, #tpu.memory_space<vmem>>, vector<512x6xbf16>
    %cst_14 = arith.constant dense<0.000000e+00> : vector<8x6xf32>
    %19 = tpu.matmul %17, %18, %cst_14 {dimension_numbers = #tpu.dot_dimension_numbers<[1], [0], [0], [1], [0, 0, 1, 1], [], []>} : vector<8x512xbf16>, vector<512x6xbf16>, vector<8x6xf32> -> vector<8x6xf32>
    %c0_15 = arith.constant 0 : index
    %c0_16 = arith.constant 0 : index
    %20 = vector.load %arg7[%c0_15, %c0_16] : memref<1x6xf32, #tpu.memory_space<vmem>>, vector<1x6xf32>
    %21 = vector.broadcast %20 : vector<1x6xf32> to vector<8x6xf32>
    %22 = arith.addf %19, %21 : vector<8x6xf32>
    %c0_17 = arith.constant 0 : index
    %c0_18 = arith.constant 0 : index
    %23 = vector.load %arg8[%c0_17, %c0_18] : memref<8x6xf32, #tpu.memory_space<vmem>>, vector<8x6xf32>
    tpu.vector_store %arg8[%c0_17, %c0_18], %22 {strides = array<i32>} : memref<8x6xf32, #tpu.memory_space<vmem>>, vector<8x6xf32>,
    return
  }
  func.func @transform_0(%arg0: i32) -> (i32, i32) {
    %c0_i32 = arith.constant 0 : i32
    %c0_i32_0 = arith.constant 0 : i32
    return %arg0, %c0_i32 : i32, i32
  }
  func.func @transform_1(%arg0: i32) -> (i32, i32) {
    %c0_i32 = arith.constant 0 : i32
    %c0_i32_0 = arith.constant 0 : i32
    %c0_i32_1 = arith.constant 0 : i32
    return %c0_i32, %c0_i32_0 : i32, i32
  }
  func.func @transform_2(%arg0: i32) -> (i32, i32) {
    %c0_i32 = arith.constant 0 : i32
    %c0_i32_0 = arith.constant 0 : i32
    %c0_i32_1 = arith.constant 0 : i32
    return %c0_i32, %c0_i32_0 : i32, i32
  }
  func.func @transform_3(%arg0: i32) -> (i32, i32) {
    %c0_i32 = arith.constant 0 : i32
    %c0_i32_0 = arith.constant 0 : i32
    %c0_i32_1 = arith.constant 0 : i32
    return %c0_i32, %c0_i32_0 : i32, i32
  }
  func.func @transform_4(%arg0: i32) -> (i32, i32) {
    %c0_i32 = arith.constant 0 : i32
    %c0_i32_0 = arith.constant 0 : i32
    %c0_i32_1 = arith.constant 0 : i32
    return %c0_i32, %c0_i32_0 : i32, i32
  }
  func.func @transform_5(%arg0: i32) -> (i32, i32) {
    %c0_i32 = arith.constant 0 : i32
    %c0_i32_0 = arith.constant 0 : i32
    %c0_i32_1 = arith.constant 0 : i32
    return %c0_i32, %c0_i32_0 : i32, i32
  }
  func.func @transform_6(%arg0: i32) -> (i32, i32) {
    %c0_i32 = arith.constant 0 : i32
    %c0_i32_0 = arith.constant 0 : i32
    %c0_i32_1 = arith.constant 0 : i32
    return %c0_i32, %c0_i32_0 : i32, i32
  }
  func.func @transform_7(%arg0: i32) -> (i32, i32) {
    %c0_i32 = arith.constant 0 : i32
    %c0_i32_0 = arith.constant 0 : i32
    return %arg0, %c0_i32 : i32, i32
  }
}

</mosaic_0001>

<bundles_post_ra>
// kernel: tpu_custom_call.1
= control target key start
LH: loop header
LB: loop body
LE: loop exit
PB: predicated region body
PF: predicated region fallthrough
CT: control target
= control target key end

     0   :  { %12 = vsyncpa [#allocation3], 0  ;;  %s2601_s0 = inlined_call_operand.vmem [shape: f32[8,18], index: 0, kind: input, shape index: {}]   ;;  %s2602_s1 = inlined_call_operand.vmem [shape: bf16[18,512], index: 1, kind: input, shape index: {}]   ;;  %s2603_s2 = inlined_call_operand.vmem [shape: f32[1,512], index: 2, kind: input, shape index: {}]   ;;  %s2604_s3 = inlined_call_operand.hbm [shape: bf16[512,512], index: 3, kind: input, shape index: {}]   ;;  %s2605_s4 = inlined_call_operand.vmem [shape: f32[1,512], index: 4, kind: input, shape index: {}]   ;;  %s2606_s5 = inlined_call_operand.vmem [shape: bf16[512,6], index: 5, kind: input, shape index: {}]   ;;  %s2607_s6 = inlined_call_operand.vmem [shape: f32[1,6], index: 6, kind: input, shape index: {}]   ;;  %s2608_s7 = inlined_call_operand.hbm [shape: f32[8,6], index: 7, kind: output, shape index: {}]  }
   0x1   :  { %13 = vsyncpa [#allocation4], 0  ;;  %s24_s26 = sshll.u32 %s2604_s3, 4  ;;  %s2375_s27 = smov [#allocation2]   ;;  %s25_s26 = int_to_ptr.hbm [resolvable:$true] %s24_s26 }
   0x2   :  { %s26_s28 = sshll.u32 %s2375_s27, 4  ;;  %s2376_s29 = smov 256   ;;  %s27_s28 = int_to_ptr.vmem [resolvable:$true] %s26_s28 }
   0x3   :  { %s2377_s30 = smov 16  }
   0x4   :  { %32 = dma.hbm_to_vmem [thread:$0]  %s25_s26, 16384, %s27_s28, [#allocation3], %s2376_s29, %s2376_s29, %s2377_s30  }
   0x5   :  { %2371 = dma.done.wait [#allocation3], 16384  }
   0x6   :  { %2372 = vsyncadd [#allocation3], 4294950912  ;;  %v50_v0 = vld [vmem:[%s2602_s1 + $0x20] sm:$0x11]  ;;  %vm96_vm0 = vcmask 1040384   ;;  %vm92_vm1 = vcmask 146432  }
   0x7   :  { %v51_v1 = vld [vmem:[%s2602_s1 + $0x28] sm:$0x11]  ;;  %v76_v2 = vunpack.c.l.b16 %v50_v0  ;;  %v77_v3 = vunpack.c.h.b16 %v50_v0  ;;  %v1496_v6 = vld [vmem:[%s2602_s1] sm:$0xf]  ;;  %v2156_v7 = vld [vmem:[%s2602_s1 + $0xc] sm:$0xf0] }
   0x8   :  { %v78_v4 = vunpack.c.l.b16 %v51_v1  ;;  %v79_v5 = vunpack.c.h.b16 %v51_v1  ;;  %v2154_v8 = vld [vmem:[%s2602_s1 + $0x4] sm:$0xf]  ;;  %v1498_v9 = vld [vmem:[%s2602_s1 + $0x10] sm:$0xf0]  ;;  %v1504_v10 = vld [vmem:[%s2602_s1 + $0x8] sm:$0xf]  ;;  %v1497_v26 = vor.u32 %v2156_v7, %v1496_v6 }
   0x9   :  { %v84_v11 = vpack.c.b16 %v76_v2, %v76_v2  ;;  %v85_v12 = vpack.c.b16 %v77_v3, %v77_v3  ;;  %v2157_v15 = vld [vmem:[%s2602_s1 + $0x14] sm:$0xf0]  ;;  %v2155_v16 = vld [vmem:[%s2602_s1 + $0xc] sm:$0xf]  ;;  %v1506_v17 = vld [vmem:[%s2602_s1 + $0x18] sm:$0xf0]  ;;  %v1501_v27 = vor.u32 %v2154_v8, %v1498_v9 }
   0xa   :  { %v86_v13 = vpack.c.b16 %v78_v4, %v78_v4  ;;  %v87_v14 = vpack.c.b16 %v79_v5, %v79_v5  ;;  %v1628_v18 = vld [vmem:[#allocation2 + $0xe0] sm:$0xf]  ;;  %v2188_v19 = vld [vmem:[#allocation2 + $0xec] sm:$0xf0]  ;;  %v1505_v29 = vor.u32 %v2157_v15, %v1504_v10  ;;  %v1509_v30 = vor.u32 %v2155_v16, %v1506_v17  ;;  %s2378_s16 = smov [#allocation5]  }
   0xb   :  { %v1756_v20 = vld [vmem:[#allocation2 + $0x1e0] sm:$0xf]  ;;  %v98_v21 = vsel %vm96_vm0, %v84_v11, 0  ;;  %v101_v22 = vsel %vm96_vm0, %v85_v12, 0  ;;  %v2220_v25 = vld [vmem:[#allocation2 + $0x1ec] sm:$0xf0]  ;;  %v1629_v33 = vor.u32 %v2188_v19, %v1628_v18 }
   0xc   :  { %v104_v23 = vsel %vm96_vm0, %v86_v13, 0  ;;  %v107_v24 = vsel %vm96_vm0, %v87_v14, 0  ;;  %115 = vmatpush.bf16.msra.mxu0 %v98_v21  ;;  %128 = vmatpush.bf16.msra.mxu1 %v101_v22  ;;  %v44_v28 = vld [vmem:[%s2601_s0] sm:$0xff]  ;;  %v1757_v34 = vor.u32 %v2220_v25, %v1756_v20  ;;  %v2252_v35 = vld [vmem:[#allocation2 + $0x2ec] sm:$0xf0]  ;;  %s1482_s17 = sshll.u32 %s2378_s16, 4  ;;  %s1483_s17 = int_to_ptr.vmem [resolvable:$true] %s1482_s17 }
   0xd   :  { %141 = vmatpush.bf16.msra.mxu2 %v104_v23  ;;  %154 = vmatpush.bf16.msra.mxu3 %v107_v24  ;;  %v1612_v31 = vld [vmem:[#allocation2 + $0xc0] sm:$0xf]  ;;  %v2284_v37 = vld [vmem:[#allocation2 + $0x3ec] sm:$0xf0]  ;;  %v45_v38 = vpack.c.bf16 %v44_v28, %v44_v28  ;;  %vm1475_vm2 = vcmask 48128  }
   0xe   :  { %v1884_v32 = vld [vmem:[#allocation2 + $0x2e0] sm:$0xf]  ;;  %v2184_v39 = vld [vmem:[#allocation2 + $0xcc] sm:$0xf0] }
   0xf   :  { %v2012_v36 = vld [vmem:[#allocation2 + $0x3e0] sm:$0xf]  ;;  %v2216_v41 = vld [vmem:[#allocation2 + $0x1cc] sm:$0xf0]  ;;  %v1885_v42 = vor.u32 %v2252_v35, %v1884_v32  ;;  %v1613_v46 = vor.u32 %v2184_v39, %v1612_v31 }
  0x10   :  { %v1740_v40 = vld [vmem:[#allocation2 + $0x1c0] sm:$0xf]  ;;  %116 = vmatpush.bf16.msra.mxu0 %v1497_v26  ;;  %129 = vmatpush.bf16.msra.mxu1 %v1501_v27  ;;  %v2013_v43 = vor.u32 %v2284_v37, %v2012_v36  ;;  %v2248_v48 = vld [vmem:[#allocation2 + $0x2cc] sm:$0xf0] }
  0x11   :  { %142 = vmatpush.bf16.msra.mxu2 %v1505_v29  ;;  %155 = vmatpush.bf16.msra.mxu3 %v1509_v30  ;;  %v1596_v44 = vld [vmem:[#allocation2 + $0xa0] sm:$0xf]  ;;  %v1741_v47 = vor.u32 %v2216_v41, %v1740_v40  ;;  %v2280_v50 = vld [vmem:[#allocation2 + $0x3cc] sm:$0xf0] }
  0x12   :  { %v1868_v45 = vld [vmem:[#allocation2 + $0x2c0] sm:$0xf]  ;;  %v2180_v51 = vld [vmem:[#allocation2 + $0xac] sm:$0xf0] }
  0x13   :  { %v1996_v49 = vld [vmem:[#allocation2 + $0x3c0] sm:$0xf]  ;;  %1510 = vmatmul.msk.bf16.vlgmr.msra.gmra.mxu0 %vm92_vm1, %v45_v38  ;;  %1511 = vmatmul.msk.bf16.vlgmr.msra.gmra.mxu1 %vm92_vm1, %v45_v38  ;;  %v2212_v53 = vld [vmem:[#allocation2 + $0x1ac] sm:$0xf0]  ;;  %v1869_v54 = vor.u32 %v2248_v48, %v1868_v45  ;;  %v1597_v58 = vor.u32 %v2180_v51, %v1596_v44  ;;  %v1630_v51 = vld [vmem:[#allocation2 + $0xf0] sm:$0xf0] }
  0x14   :  { %947 = vmatpush.bf16.msrb.mxu0 %v1629_v33  ;;  %960 = vmatpush.bf16.msrb.mxu1 %v1757_v34  ;;  %v1724_v52 = vld [vmem:[#allocation2 + $0x1a0] sm:$0xf]  ;;  %v1997_v55 = vor.u32 %v2280_v50, %v1996_v49  ;;  %v2244_v60 = vld [vmem:[#allocation2 + $0x2ac] sm:$0xf0]  ;;  %v2186_v50 = vld [vmem:[#allocation2 + $0xe4] sm:$0xf] }
  0x15   :  { %1512 = vmatmul.msk.bf16.vlgmr.msra.gmra.mxu2 %vm92_vm1, %v45_v38  ;;  %1513 = vmatmul.msk.bf16.vlgmr.msra.gmra.mxu3 %vm92_vm1, %v45_v38  ;;  %v1580_v56 = vld [vmem:[#allocation2 + $0x80] sm:$0xf]  ;;  %v1725_v59 = vor.u32 %v2212_v53, %v1724_v52  ;;  %v2276_v62 = vld [vmem:[#allocation2 + $0x3ac] sm:$0xf0]  ;;  %v2218_v52 = vld [vmem:[#allocation2 + $0x1e4] sm:$0xf] }
  0x16   :  { %973 = vmatpush.bf16.msrb.mxu2 %v1885_v42  ;;  %986 = vmatpush.bf16.msrb.mxu3 %v2013_v43  ;;  %v1852_v57 = vld [vmem:[#allocation2 + $0x2a0] sm:$0xf]  ;;  %v2176_v63 = vld [vmem:[#allocation2 + $0x8c] sm:$0xf0]  ;;  %v1758_v53 = vld [vmem:[#allocation2 + $0x1f0] sm:$0xf0] }
  0x17   :  { %v1980_v61 = vld [vmem:[#allocation2 + $0x3a0] sm:$0xf]  ;;  %v2208_v1 = vld [vmem:[#allocation2 + $0x18c] sm:$0xf0]  ;;  %v1853_v2 = vor.u32 %v2244_v60, %v1852_v57  ;;  %v1581_v6 = vor.u32 %v2176_v63, %v1580_v56  ;;  %v2182_v60 = vld [vmem:[#allocation2 + $0xc4] sm:$0xf] }
  0x18   :  { %948 = vmatpush.bf16.msrb.mxu0 %v1613_v46  ;;  %961 = vmatpush.bf16.msrb.mxu1 %v1741_v47  ;;  %v1708_v0 = vld [vmem:[#allocation2 + $0x180] sm:$0xf]  ;;  %v1981_v3 = vor.u32 %v2276_v62, %v1980_v61  ;;  %v2240_v8 = vld [vmem:[#allocation2 + $0x28c] sm:$0xf0]  ;;  %v2250_v63 = vld [vmem:[#allocation2 + $0x2e4] sm:$0xf] }
  0x19   :  { %v1564_v4 = vld [vmem:[#allocation2 + $0x60] sm:$0xf]  ;;  %v1709_v7 = vor.u32 %v2208_v1, %v1708_v0  ;;  %v2272_v10 = vld [vmem:[#allocation2 + $0x38c] sm:$0xf0]  ;;  %v1633_v0 = vor.u32 %v2186_v50, %v1630_v51  ;;  %v1761_v1 = vor.u32 %v2218_v52, %v1758_v53  ;;  %v2166_v50 = vld [vmem:[#allocation2 + $0x44] sm:$0xf] }
  0x1a   :  { %974 = vmatpush.bf16.msrb.mxu2 %v1869_v54  ;;  %987 = vmatpush.bf16.msrb.mxu3 %v1997_v55  ;;  %v1836_v5 = vld [vmem:[#allocation2 + $0x280] sm:$0xf]  ;;  %v2172_v11 = vld [vmem:[#allocation2 + $0x6c] sm:$0xf0]  ;;  %v1550_v51 = vld [vmem:[#allocation2 + $0x50] sm:$0xf0] }
  0x1b   :  { %v1964_v9 = vld [vmem:[#allocation2 + $0x380] sm:$0xf]  ;;  %v2204_v13 = vld [vmem:[#allocation2 + $0x16c] sm:$0xf0]  ;;  %v1837_v14 = vor.u32 %v2240_v8, %v1836_v5  ;;  %v1565_v18 = vor.u32 %v2172_v11, %v1564_v4  ;;  %v2014_v4 = vld [vmem:[#allocation2 + $0x3f0] sm:$0xf0] }
  0x1c   :  { %949 = vmatpush.bf16.msrb.mxu0 %v1597_v58  ;;  %962 = vmatpush.bf16.msrb.mxu1 %v1725_v59  ;;  %v1692_v12 = vld [vmem:[#allocation2 + $0x160] sm:$0xf]  ;;  %v1965_v15 = vor.u32 %v2272_v10, %v1964_v9  ;;  %v2236_v20 = vld [vmem:[#allocation2 + $0x26c] sm:$0xf0]  ;;  %v1614_v5 = vld [vmem:[#allocation2 + $0xd0] sm:$0xf0] }
  0x1d   :  { %v1548_v16 = vld [vmem:[#allocation2 + $0x40] sm:$0xf]  ;;  %v1693_v19 = vor.u32 %v2204_v13, %v1692_v12  ;;  %v2268_v22 = vld [vmem:[#allocation2 + $0x36c] sm:$0xf0]  ;;  %v2178_v12 = vld [vmem:[#allocation2 + $0xa4] sm:$0xf] }
  0x1e   :  { %975 = vmatpush.bf16.msrb.mxu2 %v1853_v2  ;;  %988 = vmatpush.bf16.msrb.mxu3 %v1981_v3  ;;  %v1820_v17 = vld [vmem:[#allocation2 + $0x260] sm:$0xf]  ;;  %v2168_v23 = vld [vmem:[#allocation2 + $0x4c] sm:$0xf0]  ;;  %v1886_v2 = vld [vmem:[#allocation2 + $0x2f0] sm:$0xf0] }
  0x1f   :  { %v1948_v21 = vld [vmem:[#allocation2 + $0x360] sm:$0xf]  ;;  %v2200_v25 = vld [vmem:[#allocation2 + $0x14c] sm:$0xf0]  ;;  %v1821_v26 = vor.u32 %v2236_v20, %v1820_v17  ;;  %v1549_v30 = vor.u32 %v2168_v23, %v1548_v16  ;;  %v2282_v3 = vld [vmem:[#allocation2 + $0x3e4] sm:$0xf]  ;;  %v1889_v10 = vor.u32 %v2250_v63, %v1886_v2 }
  0x20   :  { %950 = vmatpush.bf16.msrb.mxu0 %v1581_v6  ;;  %963 = vmatpush.bf16.msrb.mxu1 %v1709_v7  ;;  %v1676_v24 = vld [vmem:[#allocation2 + $0x140] sm:$0xf]  ;;  %v1949_v27 = vor.u32 %v2268_v22, %v1948_v21  ;;  %v2232_v32 = vld [vmem:[#allocation2 + $0x24c] sm:$0xf0]  ;;  %v2214_v6 = vld [vmem:[#allocation2 + $0x1c4] sm:$0xf]  ;;  %v2017_v11 = vor.u32 %v2282_v3, %v2014_v4 }
  0x21   :  { %v1532_v28 = vld [vmem:[#allocation2 + $0x20] sm:$0xf]  ;;  %v1677_v31 = vor.u32 %v2200_v25, %v1676_v24  ;;  %v2264_v34 = vld [vmem:[#allocation2 + $0x34c] sm:$0xf0]  ;;  %v1742_v7 = vld [vmem:[#allocation2 + $0x1d0] sm:$0xf0] }
  0x22   :  { %976 = vmatpush.bf16.msrb.mxu2 %v1837_v14  ;;  %989 = vmatpush.bf16.msrb.mxu3 %v1965_v15  ;;  %v1804_v29 = vld [vmem:[#allocation2 + $0x240] sm:$0xf]  ;;  %v2164_v35 = vld [vmem:[#allocation2 + $0x2c] sm:$0xf0]  ;;  %v2246_v13 = vld [vmem:[#allocation2 + $0x2c4] sm:$0xf]  ;;  %v1617_v14 = vor.u32 %v2182_v60, %v1614_v5  ;;  %v1745_v15 = vor.u32 %v2214_v6, %v1742_v7 }
  0x23   :  { %v1932_v33 = vld [vmem:[#allocation2 + $0x340] sm:$0xf]  ;;  %v2196_v37 = vld [vmem:[#allocation2 + $0x12c] sm:$0xf0]  ;;  %v1805_v38 = vor.u32 %v2232_v32, %v1804_v29  ;;  %v1533_v43 = vor.u32 %v2164_v35, %v1532_v28  ;;  %v1870_v16 = vld [vmem:[#allocation2 + $0x2d0] sm:$0xf0] }
  0x24   :  { %951 = vmatpush.bf16.msrb.mxu0 %v1565_v18  ;;  %964 = vmatpush.bf16.msrb.mxu1 %v1693_v19  ;;  %v1660_v36 = vld [vmem:[#allocation2 + $0x120] sm:$0xf]  ;;  %v1933_v39 = vor.u32 %v2264_v34, %v1932_v33  ;;  %v2160_v41 = vld [vmem:[#allocation2 + $0xc] sm:$0xf0]  ;;  %v2278_v17 = vld [vmem:[#allocation2 + $0x3c4] sm:$0xf]  ;;  %v1873_v22 = vor.u32 %v2246_v13, %v1870_v16 }
  0x25   :  { %v1516_v40 = vld [vmem:[#allocation2] sm:$0xf]  ;;  %v1661_v44 = vor.u32 %v2196_v37, %v1660_v36  ;;  %v2228_v45 = vld [vmem:[#allocation2 + $0x22c] sm:$0xf0]  ;;  %v1998_v18 = vld [vmem:[#allocation2 + $0x3d0] sm:$0xf0] }
  0x26   :  { %977 = vmatpush.bf16.msrb.mxu2 %v1821_v26  ;;  %990 = vmatpush.bf16.msrb.mxu3 %v1949_v27  ;;  %v1788_v42 = vld [vmem:[#allocation2 + $0x220] sm:$0xf]  ;;  %v2260_v47 = vld [vmem:[#allocation2 + $0x32c] sm:$0xf0]  ;;  %v1517_v58 = vor.u32 %v2160_v41, %v1516_v40  ;;  %v1598_v19 = vld [vmem:[#allocation2 + $0xb0] sm:$0xf0]  ;;  %v2001_v23 = vor.u32 %v2278_v17, %v1998_v18 }
  0x27   :  { %v1916_v46 = vld [vmem:[#allocation2 + $0x320] sm:$0xf]  ;;  %v2192_v49 = vld [vmem:[#allocation2 + $0x10c] sm:$0xf0]  ;;  %v1789_v54 = vor.u32 %v2228_v45, %v1788_v42  ;;  %v2210_v20 = vld [vmem:[#allocation2 + $0x1a4] sm:$0xf]  ;;  %v1601_v26 = vor.u32 %v2178_v12, %v1598_v19 }
  0x28   :  { %952 = vmatpush.bf16.msrb.mxu0 %v1549_v30  ;;  %965 = vmatpush.bf16.msrb.mxu1 %v1677_v31  ;;  %v1644_v48 = vld [vmem:[#allocation2 + $0x100] sm:$0xf]  ;;  %v1917_v55 = vor.u32 %v2260_v47, %v1916_v46  ;;  %v2224_v57 = vld [vmem:[#allocation2 + $0x20c] sm:$0xf0]  ;;  %v1726_v21 = vld [vmem:[#allocation2 + $0x1b0] sm:$0xf0] }
  0x29   :  { %v1772_v56 = vld [vmem:[#allocation2 + $0x200] sm:$0xf]  ;;  %v1645_v59 = vor.u32 %v2192_v49, %v1644_v48  ;;  %v2256_v62 = vld [vmem:[#allocation2 + $0x30c] sm:$0xf0]  ;;  %v2174_v24 = vld [vmem:[#allocation2 + $0x84] sm:$0xf]  ;;  %v1729_v27 = vor.u32 %v2210_v20, %v1726_v21 }
  0x2a   :  { %978 = vmatpush.bf16.msrb.mxu2 %v1805_v38  ;;  %991 = vmatpush.bf16.msrb.mxu3 %v1933_v39  ;;  %v1900_v61 = vld [vmem:[#allocation2 + $0x300] sm:$0xf]  ;;  %v1773_v8 = vor.u32 %v2224_v57, %v1772_v56  ;;  %v2242_v25 = vld [vmem:[#allocation2 + $0x2a4] sm:$0xf]  ;;  %v1854_v28 = vld [vmem:[#allocation2 + $0x2b0] sm:$0xf0] }
  0x2b   :  { %v1901_v9 = vor.u32 %v2256_v62, %v1900_v61  ;;  %v2274_v29 = vld [vmem:[#allocation2 + $0x3a4] sm:$0xf]  ;;  %v1982_v30 = vld [vmem:[#allocation2 + $0x3b0] sm:$0xf0]  ;;  %v1857_v34 = vor.u32 %v2242_v25, %v1854_v28  ;;  %v52_v28 = vld [vmem:[%s2603_s2] sm:$0xf] }
  0x2c   :  { %953 = vmatpush.bf16.msrb.mxu0 %v1533_v43  ;;  %966 = vmatpush.bf16.msrb.mxu1 %v1661_v44  ;;  %v1582_v31 = vld [vmem:[#allocation2 + $0x90] sm:$0xf0]  ;;  %v2206_v32 = vld [vmem:[#allocation2 + $0x184] sm:$0xf]  ;;  %v1985_v35 = vor.u32 %v2274_v29, %v1982_v30  ;;  %v54_v29 = vperm.slane %v52_v28, 0  ;;  %v55_v30 = vperm.slane %v52_v28, 1 }
  0x2d   :  { %v1710_v33 = vld [vmem:[#allocation2 + $0x190] sm:$0xf0]  ;;  %v2170_v36 = vld [vmem:[#allocation2 + $0x64] sm:$0xf]  ;;  %v1585_v38 = vor.u32 %v2174_v24, %v1582_v31 }
  0x2e   :  { %979 = vmatpush.bf16.msrb.mxu2 %v1789_v54  ;;  %992 = vmatpush.bf16.msrb.mxu3 %v1917_v55  ;;  %v2238_v37 = vld [vmem:[#allocation2 + $0x284] sm:$0xf]  ;;  %v1713_v39 = vor.u32 %v2206_v32, %v1710_v33  ;;  %v1838_v40 = vld [vmem:[#allocation2 + $0x290] sm:$0xf0]  ;;  %v1553_v54 = vor.u32 %v2166_v50, %v1550_v51  ;;  %v1636_v33 = vld [vmem:[#allocation2 + $0xe8] sm:$0xf] }
  0x2f   :  { %v2270_v41 = vld [vmem:[#allocation2 + $0x384] sm:$0xf]  ;;  %v1966_v42 = vld [vmem:[#allocation2 + $0x390] sm:$0xf0]  ;;  %v1841_v46 = vor.u32 %v2238_v37, %v1838_v40  ;;  %v1764_v37 = vld [vmem:[#allocation2 + $0x1e8] sm:$0xf] }
  0x30   :  { %954 = vmatpush.bf16.msrb.mxu0 %v1517_v58  ;;  %967 = vmatpush.bf16.msrb.mxu1 %v1645_v59  ;;  %v1566_v43 = vld [vmem:[#allocation2 + $0x70] sm:$0xf0]  ;;  %v2202_v44 = vld [vmem:[#allocation2 + $0x164] sm:$0xf]  ;;  %v1969_v47 = vor.u32 %v2270_v41, %v1966_v42  ;;  %v56_v41 = vperm.slane %v52_v28, 2  ;;  %v57_v42 = vperm.slane %v52_v28, 3 }
  0x31   :  { %v1694_v45 = vld [vmem:[#allocation2 + $0x170] sm:$0xf0]  ;;  %v1569_v48 = vor.u32 %v2170_v36, %v1566_v43  ;;  %v2198_v52 = vld [vmem:[#allocation2 + $0x144] sm:$0xf]  ;;  %v2189_v36 = vld [vmem:[#allocation2 + $0xf4] sm:$0xf0] }
  0x32   :  { %980 = vmatpush.bf16.msrb.mxu2 %v1773_v8  ;;  %993 = vmatpush.bf16.msrb.mxu3 %v1901_v9  ;;  %v1697_v49 = vor.u32 %v2202_v44, %v1694_v45  ;;  %v1678_v53 = vld [vmem:[#allocation2 + $0x150] sm:$0xf0]  ;;  %v2234_v56 = vld [vmem:[#allocation2 + $0x264] sm:$0xf]  ;;  %v1637_v43 = vor.u32 %v2189_v36, %v1636_v33  ;;  %v1620_v45 = vld [vmem:[#allocation2 + $0xc8] sm:$0xf] }
  0x33   :  { %v1681_v55 = vor.u32 %v2198_v52, %v1678_v53  ;;  %v1822_v57 = vld [vmem:[#allocation2 + $0x270] sm:$0xf0]  ;;  %v2266_v58 = vld [vmem:[#allocation2 + $0x364] sm:$0xf]  ;;  %v2217_v50 = vld [vmem:[#allocation2 + $0x1d4] sm:$0xf0] }
  0x34   :  { %999 = vmatpush.bf16.msra.mxu0 %v1633_v0  ;;  %1012 = vmatpush.bf16.msra.mxu1 %v1761_v1  ;;  %v1825_v59 = vor.u32 %v2234_v56, %v1822_v57  ;;  %v1950_v60 = vld [vmem:[#allocation2 + $0x370] sm:$0xf0]  ;;  %v2162_v62 = vld [vmem:[#allocation2 + $0x24] sm:$0xf]  ;;  %v2020_v56 = vld [vmem:[#allocation2 + $0x3e8] sm:$0xf] }
  0x35   :  { %v1953_v61 = vor.u32 %v2266_v58, %v1950_v60  ;;  %v1534_v63 = vld [vmem:[#allocation2 + $0x30] sm:$0xf0]  ;;  %v2194_v1 = vld [vmem:[#allocation2 + $0x124] sm:$0xf]  ;;  %v2277_v28 = vld [vmem:[#allocation2 + $0x3b4] sm:$0xf0] }
  0x36   :  { %1025 = vmatpush.bf16.msra.mxu2 %v1889_v10  ;;  %1038 = vmatpush.bf16.msra.mxu3 %v2017_v11  ;;  %v1537_v0 = vor.u32 %v2162_v62, %v1534_v63  ;;  %v1662_v2 = vld [vmem:[#allocation2 + $0x130] sm:$0xf0]  ;;  %v2230_v4 = vld [vmem:[#allocation2 + $0x244] sm:$0xf]  ;;  %v2285_v62 = vld [vmem:[#allocation2 + $0x3f4] sm:$0xf0] }
  0x37   :  { %v1665_v3 = vor.u32 %v2194_v1, %v1662_v2  ;;  %v1806_v5 = vld [vmem:[#allocation2 + $0x250] sm:$0xf0]  ;;  %v2262_v6 = vld [vmem:[#allocation2 + $0x344] sm:$0xf]  ;;  %v1604_v63 = vld [vmem:[#allocation2 + $0xa8] sm:$0xf] }
  0x38   :  { %1000 = vmatpush.bf16.msra.mxu0 %v1617_v14  ;;  %1013 = vmatpush.bf16.msra.mxu1 %v1745_v15  ;;  %v1809_v7 = vor.u32 %v2230_v4, %v1806_v5  ;;  %v1934_v8 = vld [vmem:[#allocation2 + $0x350] sm:$0xf0]  ;;  %v2158_v10 = vld [vmem:[#allocation2 + $0x4] sm:$0xf]  ;;  %v1732_v1 = vld [vmem:[#allocation2 + $0x1a8] sm:$0xf] }
  0x39   :  { %v1937_v9 = vor.u32 %v2262_v6, %v1934_v8  ;;  %v1518_v11 = vld [vmem:[#allocation2 + $0x10] sm:$0xf0]  ;;  %v2190_v12 = vld [vmem:[#allocation2 + $0x104] sm:$0xf]  ;;  %v2213_v2 = vld [vmem:[#allocation2 + $0x1b4] sm:$0xf0]  ;;  %v2021_v6 = vor.u32 %v2285_v62, %v2020_v56 }
  0x3a   :  { %1026 = vmatpush.bf16.msra.mxu2 %v1873_v22  ;;  %1039 = vmatpush.bf16.msra.mxu3 %v2001_v23  ;;  %v1521_v13 = vor.u32 %v2158_v10, %v1518_v11  ;;  %v1646_v14 = vld [vmem:[#allocation2 + $0x110] sm:$0xf0]  ;;  %v2226_v16 = vld [vmem:[#allocation2 + $0x224] sm:$0xf]  ;;  %v1876_v8 = vld [vmem:[#allocation2 + $0x2c8] sm:$0xf] }
  0x3b   :  { %v1649_v15 = vor.u32 %v2190_v12, %v1646_v14  ;;  %v1790_v17 = vld [vmem:[#allocation2 + $0x230] sm:$0xf0]  ;;  %v2258_v19 = vld [vmem:[#allocation2 + $0x324] sm:$0xf]  ;;  %v1733_v12 = vor.u32 %v2213_v2, %v1732_v1  ;;  %v2281_v14 = vld [vmem:[#allocation2 + $0x3d4] sm:$0xf0] }
  0x3c   :  { %1001 = vmatpush.bf16.msra.mxu0 %v1601_v26  ;;  %1014 = vmatpush.bf16.msra.mxu1 %v1729_v27  ;;  %v1793_v18 = vor.u32 %v2226_v16, %v1790_v17  ;;  %v1918_v20 = vld [vmem:[#allocation2 + $0x330] sm:$0xf0]  ;;  %v2222_v22 = vld [vmem:[#allocation2 + $0x204] sm:$0xf]  ;;  %v2177_v16 = vld [vmem:[#allocation2 + $0x94] sm:$0xf0] }
  0x3d   :  { %v1921_v21 = vor.u32 %v2258_v19, %v1918_v20  ;;  %v1774_v23 = vld [vmem:[#allocation2 + $0x210] sm:$0xf0]  ;;  %v2254_v25 = vld [vmem:[#allocation2 + $0x304] sm:$0xf]  ;;  %v1716_v17 = vld [vmem:[#allocation2 + $0x188] sm:$0xf] }
  0x3e   :  { %1027 = vmatpush.bf16.msra.mxu2 %v1857_v34  ;;  %1040 = vmatpush.bf16.msra.mxu3 %v1985_v35  ;;  %v1777_v24 = vor.u32 %v2222_v22, %v1774_v23  ;;  %v1902_v26 = vld [vmem:[#allocation2 + $0x310] sm:$0xf0]  ;;  %v1860_v23 = vld [vmem:[#allocation2 + $0x2a8] sm:$0xf]  ;;  %v2241_v36 = vld [vmem:[#allocation2 + $0x294] sm:$0xf0] }
  0x3f   :  { %v1905_v27 = vor.u32 %v2254_v25, %v1902_v26  ;;  %v2245_v26 = vld [vmem:[#allocation2 + $0x2b4] sm:$0xf0] }
  0x40   :  { %1002 = vmatpush.bf16.msra.mxu0 %v1585_v38  ;;  %1015 = vmatpush.bf16.msra.mxu1 %v1713_v39  ;;  %v2221_v38 = vld [vmem:[#allocation2 + $0x1f4] sm:$0xf0]  ;;  %v1861_v33 = vor.u32 %v2245_v26, %v1860_v23  ;;  %v2183_v23 = vld [vmem:[#allocation2 + $0xcc] sm:$0xf] }
  0x41   :  { %v1765_v44 = vor.u32 %v2221_v38, %v1764_v37  ;;  %v1972_v37 = vld [vmem:[#allocation2 + $0x388] sm:$0xf]  ;;  %v2273_v38 = vld [vmem:[#allocation2 + $0x394] sm:$0xf0] }
  0x42   :  { %1028 = vmatpush.bf16.msra.mxu2 %v1841_v46  ;;  %1041 = vmatpush.bf16.msra.mxu3 %v1969_v47  ;;  %v2185_v46 = vld [vmem:[#allocation2 + $0xd4] sm:$0xf0] }
  0x43   :  { %v1621_v53 = vor.u32 %v2185_v46, %v1620_v45  ;;  %v1973_v46 = vor.u32 %v2273_v38, %v1972_v37  ;;  %v2165_v56 = vld [vmem:[#allocation2 + $0x34] sm:$0xf0] }
  0x44   :  { %1003 = vmatpush.bf16.msra.mxu0 %v1569_v48  ;;  %1016 = vmatpush.bf16.msra.mxu1 %v1697_v49  ;;  %v1748_v49 = vld [vmem:[#allocation2 + $0x1c8] sm:$0xf]  ;;  %v2233_v62 = vld [vmem:[#allocation2 + $0x254] sm:$0xf0] }
  0x46   :  { %1029 = vmatpush.bf16.msra.mxu2 %v1825_v59  ;;  %1042 = vmatpush.bf16.msra.mxu3 %v1953_v61  ;;  %v1749_v61 = vor.u32 %v2217_v50, %v1748_v49  ;;  %v1828_v49 = vld [vmem:[#allocation2 + $0x268] sm:$0xf]  ;;  %v2237_v50 = vld [vmem:[#allocation2 + $0x274] sm:$0xf0] }
  0x48   :  { %1004 = vmatpush.bf16.msra.mxu0 %v1553_v54  ;;  %1017 = vmatpush.bf16.msra.mxu1 %v1681_v55  ;;  %v1892_v54 = vld [vmem:[#allocation2 + $0x2e8] sm:$0xf]  ;;  %v2253_v55 = vld [vmem:[#allocation2 + $0x2f4] sm:$0xf0] }
  0x49   :  { %v1893_v5 = vor.u32 %v2253_v55, %v1892_v54  ;;  %v1540_v55 = vld [vmem:[#allocation2 + $0x28] sm:$0xf] }
  0x4a   :  { %1030 = vmatpush.bf16.msra.mxu2 %v1809_v7  ;;  %1043 = vmatpush.bf16.msra.mxu3 %v1937_v9  ;;  %v2249_v9 = vld [vmem:[#allocation2 + $0x2d4] sm:$0xf0]  ;;  %v1541_v1 = vor.u32 %v2165_v56, %v1540_v55  ;;  %v2175_v55 = vld [vmem:[#allocation2 + $0x8c] sm:$0xf]  ;;  %v1590_v56 = vld [vmem:[#allocation2 + $0x98] sm:$0xf0] }
  0x4c   :  { %1005 = vmatpush.bf16.msra.mxu0 %v1537_v0  ;;  %1018 = vmatpush.bf16.msra.mxu1 %v1665_v3  ;;  %v2181_v0 = vld [vmem:[#allocation2 + $0xb4] sm:$0xf0] }
  0x4d   :  { %v1605_v7 = vor.u32 %v2181_v0, %v1604_v63  ;;  %v1940_v63 = vld [vmem:[#allocation2 + $0x348] sm:$0xf]  ;;  %v2265_v0 = vld [vmem:[#allocation2 + $0x354] sm:$0xf0] }
  0x4e   :  { %1031 = vmatpush.bf16.msra.mxu2 %v1793_v18  ;;  %1044 = vmatpush.bf16.msra.mxu3 %v1921_v21  ;;  %v2209_v18 = vld [vmem:[#allocation2 + $0x194] sm:$0xf0]  ;;  %v1877_v21 = vor.u32 %v2249_v9, %v1876_v8  ;;  %v1638_v8 = vld [vmem:[#allocation2 + $0xf8] sm:$0xf0] }
  0x4f   :  { %v1717_v25 = vor.u32 %v2209_v18, %v1716_v17  ;;  %v1924_v17 = vld [vmem:[#allocation2 + $0x328] sm:$0xf]  ;;  %v2261_v18 = vld [vmem:[#allocation2 + $0x334] sm:$0xf0] }
  0x50   :  { %1006 = vmatpush.bf16.msra.mxu0 %v1521_v13  ;;  %1019 = vmatpush.bf16.msra.mxu1 %v1649_v15  ;;  %v2004_v13 = vld [vmem:[#allocation2 + $0x3c8] sm:$0xf] }
  0x51   :  { %v1588_v15 = vld [vmem:[#allocation2 + $0x88] sm:$0xf]  ;;  %v2005_v22 = vor.u32 %v2281_v14, %v2004_v13  ;;  %v2219_v13 = vld [vmem:[#allocation2 + $0x1ec] sm:$0xf]  ;;  %v1766_v14 = vld [vmem:[#allocation2 + $0x1f8] sm:$0xf0] }
  0x52   :  { %1032 = vmatpush.bf16.msra.mxu2 %v1777_v24  ;;  %1045 = vmatpush.bf16.msra.mxu3 %v1905_v27  ;;  %v1589_v24 = vor.u32 %v2177_v16, %v1588_v15  ;;  %v1988_v27 = vld [vmem:[#allocation2 + $0x3a8] sm:$0xf]  ;;  %v2229_v16 = vld [vmem:[#allocation2 + $0x234] sm:$0xf0] }
  0x53   :  { %v1796_v15 = vld [vmem:[#allocation2 + $0x228] sm:$0xf] }
  0x54   :  { %v1797_v26 = vor.u32 %v2229_v16, %v1796_v15 }
  0x90   :  { %v118_v31 = vpop.f32.mrf.mxu0  ;;  %v131_v32 = vpop.f32.mrf.mxu1 }
  0x91   :  { %v119_v34 = vadd.f32 %v118_v31, %v54_v29  ;;  %v132_v35 = vadd.f32 %v131_v32, %v55_v30  ;;  %v1572_v29 = vld [vmem:[#allocation2 + $0x68] sm:$0xf]  ;;  %v2173_v30 = vld [vmem:[#allocation2 + $0x74] sm:$0xf0] }
  0x92   :  { %v1700_v31 = vld [vmem:[#allocation2 + $0x168] sm:$0xf]  ;;  %v2205_v32 = vld [vmem:[#allocation2 + $0x174] sm:$0xf0] }
  0x93   :  { %v161_v39 = vmax.f32 %v119_v34, 0.0  ;;  %v162_v40 = vmax.f32 %v132_v35, 0.0  ;;  %v1989_v34 = vor.u32 %v2277_v28, %v1988_v27  ;;  %v1844_v35 = vld [vmem:[#allocation2 + $0x288] sm:$0xf]  ;;  %v1925_v27 = vor.u32 %v2261_v18, %v1924_v17  ;;  %v1750_v28 = vld [vmem:[#allocation2 + $0x1d8] sm:$0xf0] }
  0x94   :  { %v1845_v45 = vor.u32 %v2241_v36, %v1844_v35  ;;  %v2283_v35 = vld [vmem:[#allocation2 + $0x3ec] sm:$0xf]  ;;  %v2022_v36 = vld [vmem:[#allocation2 + $0x3f8] sm:$0xf0] }
  0x95   :  { %v2466_v47 = vpack.c.bf16 %v161_v39, %v161_v39  ;;  %v2468_v48 = vpack.c.bf16 %v162_v40, %v162_v40  ;;  %v1573_v39 = vor.u32 %v2173_v30, %v1572_v29  ;;  %v1701_v40 = vor.u32 %v2205_v32, %v1700_v31  ;;  %v1780_v29 = vld [vmem:[#allocation2 + $0x208] sm:$0xf]  ;;  %v2225_v30 = vld [vmem:[#allocation2 + $0x214] sm:$0xf0]  ;;  %v2167_v17 = vld [vmem:[#allocation2 + $0x4c] sm:$0xf] }
  0x96   :  { %v1908_v31 = vld [vmem:[#allocation2 + $0x308] sm:$0xf]  ;;  %v2257_v32 = vld [vmem:[#allocation2 + $0x314] sm:$0xf0]  ;;  %v1558_v18 = vld [vmem:[#allocation2 + $0x58] sm:$0xf0] }
  0x97   :  { %955 = vmatmul.bf16.vlgmr.msrb.gmra.mxu0 %v2466_v47  ;;  %968 = vmatmul.bf16.vlgmr.msrb.gmra.mxu1 %v2468_v48 }
  0x98   :  { %v144_v51 = vpop.f32.mrf.mxu2  ;;  %v157_v52 = vpop.f32.mrf.mxu3  ;;  %1051 = vmatpush.bf16.msrb.mxu0 %v1637_v43  ;;  %1064 = vmatpush.bf16.msrb.mxu1 %v1765_v44  ;;  %v1684_v43 = vld [vmem:[#allocation2 + $0x148] sm:$0xf]  ;;  %v2201_v44 = vld [vmem:[#allocation2 + $0x154] sm:$0xf0] }
  0x99   :  { %v145_v57 = vadd.f32 %v144_v51, %v56_v41  ;;  %v158_v58 = vadd.f32 %v157_v52, %v57_v42  ;;  %v120_v59 = vpop.f32.mrf.mxu0  ;;  %v133_v60 = vpop.f32.mrf.mxu1  ;;  %v1556_v41 = vld [vmem:[#allocation2 + $0x48] sm:$0xf]  ;;  %v2169_v42 = vld [vmem:[#allocation2 + $0x54] sm:$0xf0]  ;;  %v1685_v54 = vor.u32 %v2201_v44, %v1684_v43  ;;  %v2211_v43 = vld [vmem:[#allocation2 + $0x1ac] sm:$0xf] }
  0x9a   :  { %v1956_v51 = vld [vmem:[#allocation2 + $0x368] sm:$0xf]  ;;  %v2269_v52 = vld [vmem:[#allocation2 + $0x374] sm:$0xf0]  ;;  %v1829_v59 = vor.u32 %v2237_v50, %v1828_v49  ;;  %v1734_v44 = vld [vmem:[#allocation2 + $0x1b8] sm:$0xf0] }
  0x9b   :  { %v163_v3 = vmax.f32 %v145_v57, 0.0  ;;  %v164_v4 = vmax.f32 %v158_v58, 0.0  ;;  %v1668_v57 = vld [vmem:[#allocation2 + $0x128] sm:$0xf]  ;;  %v2197_v58 = vld [vmem:[#allocation2 + $0x134] sm:$0xf0]  ;;  %v1957_v60 = vor.u32 %v2269_v52, %v1956_v51 }
  0x9c   :  { %1052 = vmatpush.bf16.msrb.mxu0 %v1621_v53  ;;  %1065 = vmatpush.bf16.msrb.mxu1 %v1749_v61  ;;  %v1557_v53 = vor.u32 %v2169_v42, %v1556_v41  ;;  %v1812_v61 = vld [vmem:[#allocation2 + $0x248] sm:$0xf]  ;;  %v1669_v2 = vor.u32 %v2197_v58, %v1668_v57  ;;  %v1909_v41 = vor.u32 %v2257_v32, %v1908_v31  ;;  %v1606_v42 = vld [vmem:[#allocation2 + $0xb8] sm:$0xf0]  ;;  %v2247_v49 = vld [vmem:[#allocation2 + $0x2cc] sm:$0xf] }
  0x9d   :  { %v2472_v10 = vpack.c.bf16 %v163_v3, %v163_v3  ;;  %v2474_v11 = vpack.c.bf16 %v164_v4, %v164_v4  ;;  %v1524_v3 = vld [vmem:[#allocation2 + $0x8] sm:$0xf]  ;;  %v2161_v4 = vld [vmem:[#allocation2 + $0x14] sm:$0xf0]  ;;  %v1813_v9 = vor.u32 %v2233_v62, %v1812_v61  ;;  %v1878_v50 = vld [vmem:[#allocation2 + $0x2d8] sm:$0xf0] }
  0x9e   :  { %v2279_v51 = vld [vmem:[#allocation2 + $0x3cc] sm:$0xf]  ;;  %v2006_v52 = vld [vmem:[#allocation2 + $0x3d8] sm:$0xf0] }
  0x9f   :  { %981 = vmatmul.bf16.vlgmr.msrb.gmra.mxu2 %v2472_v10  ;;  %994 = vmatmul.bf16.vlgmr.msrb.gmra.mxu3 %v2474_v11  ;;  %v2207_v57 = vld [vmem:[#allocation2 + $0x18c] sm:$0xf]  ;;  %v1718_v58 = vld [vmem:[#allocation2 + $0x198] sm:$0xf0] }
  0xa0   :  { %1077 = vmatpush.bf16.msrb.mxu2 %v1893_v5  ;;  %1090 = vmatpush.bf16.msrb.mxu3 %v2021_v6  ;;  %v146_v19 = vpop.f32.mrf.mxu2  ;;  %v159_v20 = vpop.f32.mrf.mxu3  ;;  %v1652_v5 = vld [vmem:[#allocation2 + $0x108] sm:$0xf]  ;;  %v2193_v6 = vld [vmem:[#allocation2 + $0x114] sm:$0xf0]  ;;  %v2243_v61 = vld [vmem:[#allocation2 + $0x2ac] sm:$0xf] }
  0xa1   :  { %1053 = vmatpush.bf16.msrb.mxu0 %v1605_v7  ;;  %1066 = vmatpush.bf16.msrb.mxu1 %v1733_v12  ;;  %v2187_v7 = vld [vmem:[#allocation2 + $0xec] sm:$0xf]  ;;  %v1941_v12 = vor.u32 %v2265_v0, %v1940_v63  ;;  %v1525_v19 = vor.u32 %v2161_v4, %v1524_v3  ;;  %v1653_v20 = vor.u32 %v2193_v6, %v1652_v5  ;;  %v1862_v62 = vld [vmem:[#allocation2 + $0x2b8] sm:$0xf0] }
  0xa2   :  { %v2275_v63 = vld [vmem:[#allocation2 + $0x3ac] sm:$0xf]  ;;  %v1990_v0 = vld [vmem:[#allocation2 + $0x3b8] sm:$0xf0] }
  0xa3   :  { %v2171_v3 = vld [vmem:[#allocation2 + $0x6c] sm:$0xf]  ;;  %v1574_v4 = vld [vmem:[#allocation2 + $0x78] sm:$0xf0] }
  0xa4   :  { %1078 = vmatpush.bf16.msrb.mxu2 %v1877_v21  ;;  %1091 = vmatpush.bf16.msrb.mxu3 %v2005_v22  ;;  %v1641_v21 = vor.u32 %v2187_v7, %v1638_v8  ;;  %v1769_v22 = vor.u32 %v2219_v13, %v1766_v14  ;;  %v2203_v5 = vld [vmem:[#allocation2 + $0x16c] sm:$0xf]  ;;  %v1702_v6 = vld [vmem:[#allocation2 + $0x178] sm:$0xf0]  ;;  %v1865_v7 = vor.u32 %v2243_v61, %v1862_v62  ;;  %v2292_v62 = vld [vmem:[%s2606_s5 + $0x30] sm:$0xff] }
  0xa5   :  { %1054 = vmatpush.bf16.msrb.mxu0 %v1589_v24  ;;  %1067 = vmatpush.bf16.msrb.mxu1 %v1717_v25  ;;  %v1622_v24 = vld [vmem:[#allocation2 + $0xd8] sm:$0xf0]  ;;  %v2215_v25 = vld [vmem:[#allocation2 + $0x1cc] sm:$0xf]  ;;  %v1993_v8 = vor.u32 %v2275_v63, %v1990_v0  ;;  %v1577_v15 = vor.u32 %v2171_v3, %v1574_v4  ;;  %v1705_v16 = vor.u32 %v2203_v5, %v1702_v6  ;;  %v2286_v5 = vld [vmem:[%s2606_s5] sm:$0xff] }
  0xa6   :  { %v1625_v37 = vor.u32 %v2183_v23, %v1622_v24  ;;  %v1753_v38 = vor.u32 %v2215_v25, %v1750_v28  ;;  %v2271_v13 = vld [vmem:[#allocation2 + $0x38c] sm:$0xf]  ;;  %v1974_v14 = vld [vmem:[#allocation2 + $0x398] sm:$0xf0]  ;;  %v2298_v6 = vld [vmem:[%s2606_s5 + $0x60] sm:$0xff] }
  0xa7   :  { %1007 = vmatmul.bf16.vlgmr.msra.gmra.mxu0 %v2466_v47  ;;  %1020 = vmatmul.bf16.vlgmr.msra.gmra.mxu1 %v2468_v48  ;;  %v2235_v23 = vld [vmem:[#allocation2 + $0x26c] sm:$0xf]  ;;  %v1830_v24 = vld [vmem:[#allocation2 + $0x278] sm:$0xf0] }
  0xa8   :  { %1079 = vmatpush.bf16.msrb.mxu2 %v1861_v33  ;;  %1092 = vmatpush.bf16.msrb.mxu3 %v1989_v34  ;;  %v2251_v33 = vld [vmem:[#allocation2 + $0x2ec] sm:$0xf]  ;;  %v1894_v34 = vld [vmem:[#allocation2 + $0x2f8] sm:$0xf0] }
  0xa9   :  { %1055 = vmatpush.bf16.msrb.mxu0 %v1573_v39  ;;  %1068 = vmatpush.bf16.msrb.mxu1 %v1701_v40  ;;  %v2179_v39 = vld [vmem:[#allocation2 + $0xac] sm:$0xf]  ;;  %v1781_v40 = vor.u32 %v2225_v30, %v1780_v29  ;;  %v1542_v30 = vld [vmem:[#allocation2 + $0x38] sm:$0xf0] }
  0xaa   :  { %v2267_v25 = vld [vmem:[#allocation2 + $0x36c] sm:$0xf]  ;;  %v1670_v32 = vld [vmem:[#allocation2 + $0x138] sm:$0xf0] }
  0xab   :  { %v2163_v29 = vld [vmem:[#allocation2 + $0x2c] sm:$0xf]  ;;  %v1910_v61 = vld [vmem:[#allocation2 + $0x318] sm:$0xf0] }
  0xac   :  { %1080 = vmatpush.bf16.msrb.mxu2 %v1845_v45  ;;  %1093 = vmatpush.bf16.msrb.mxu3 %v1973_v46  ;;  %v1897_v45 = vor.u32 %v2251_v33, %v1894_v34  ;;  %v2025_v46 = vor.u32 %v2283_v35, %v2022_v36  ;;  %v2195_v31 = vld [vmem:[#allocation2 + $0x12c] sm:$0xf]  ;;  %v1833_v33 = vor.u32 %v2235_v23, %v1830_v24  ;;  %v1814_v36 = vld [vmem:[#allocation2 + $0x258] sm:$0xf0] }
  0xad   :  { %1056 = vmatpush.bf16.msrb.mxu0 %v1557_v53  ;;  %1069 = vmatpush.bf16.msrb.mxu1 %v1685_v54  ;;  %v1609_v53 = vor.u32 %v2179_v39, %v1606_v42  ;;  %v1737_v54 = vor.u32 %v2211_v43, %v1734_v44  ;;  %v2231_v35 = vld [vmem:[#allocation2 + $0x24c] sm:$0xf]  ;;  %v1545_v39 = vor.u32 %v2163_v29, %v1542_v30  ;;  %v1526_v42 = vld [vmem:[#allocation2 + $0x18] sm:$0xf0] }
  0xae   :  { %v2191_v43 = vld [vmem:[#allocation2 + $0x10c] sm:$0xf]  ;;  %v1654_v44 = vld [vmem:[#allocation2 + $0x118] sm:$0xf0] }
  0xaf   :  { %1033 = vmatmul.bf16.vlgmr.msra.gmra.mxu2 %v2472_v10  ;;  %1046 = vmatmul.bf16.vlgmr.msra.gmra.mxu3 %v2474_v11  ;;  %v2287_v3 = vld [vmem:[%s2606_s5 + $0x8] sm:$0xff] }
  0xb0   :  { %1081 = vmatpush.bf16.msrb.mxu2 %v1829_v59  ;;  %1094 = vmatpush.bf16.msrb.mxu3 %v1957_v60  ;;  %v1881_v59 = vor.u32 %v2247_v49, %v1878_v50  ;;  %v2009_v60 = vor.u32 %v2279_v51, %v2006_v52  ;;  %v2227_v49 = vld [vmem:[#allocation2 + $0x22c] sm:$0xf]  ;;  %v1798_v50 = vld [vmem:[#allocation2 + $0x238] sm:$0xf0] }
  0xb1   :  { %1057 = vmatpush.bf16.msrb.mxu0 %v1541_v1  ;;  %1070 = vmatpush.bf16.msrb.mxu1 %v1669_v2  ;;  %v1593_v1 = vor.u32 %v2175_v55, %v1590_v56  ;;  %v1721_v2 = vor.u32 %v2207_v57, %v1718_v58  ;;  %v2259_v51 = vld [vmem:[#allocation2 + $0x32c] sm:$0xf]  ;;  %v1926_v52 = vld [vmem:[#allocation2 + $0x338] sm:$0xf0]  ;;  %v1801_v56 = vor.u32 %v2227_v49, %v1798_v50 }
  0xb2   :  { %v2293_v55 = vld [vmem:[%s2606_s5 + $0x38] sm:$0xff]  ;;  %v1929_v57 = vor.u32 %v2259_v51, %v1926_v52  ;;  %v2223_v58 = vld [vmem:[#allocation2 + $0x20c] sm:$0xf]  ;;  %v2314_v52 = vld [vmem:[%s2606_s5 + $0xe0] sm:$0xff] }
  0xb3   :  { %v2299_v4 = vld [vmem:[%s2606_s5 + $0x68] sm:$0xff] }
  0xb4   :  { %1082 = vmatpush.bf16.msrb.mxu2 %v1813_v9  ;;  %1095 = vmatpush.bf16.msrb.mxu3 %v1941_v12  ;;  %v2239_v9 = vld [vmem:[#allocation2 + $0x28c] sm:$0xf]  ;;  %v1846_v12 = vld [vmem:[#allocation2 + $0x298] sm:$0xf0] }
  0xb5   :  { %1058 = vmatpush.bf16.msrb.mxu0 %v1525_v19  ;;  %1071 = vmatpush.bf16.msrb.mxu1 %v1653_v20  ;;  %v2199_v19 = vld [vmem:[#allocation2 + $0x14c] sm:$0xf]  ;;  %v1686_v20 = vld [vmem:[#allocation2 + $0x158] sm:$0xf0] }
  0xb6   :  { %v1689_v28 = vor.u32 %v2199_v19, %v1686_v20  ;;  %v2294_v19 = vld [vmem:[%s2606_s5 + $0x40] sm:$0xff]  ;;  %v2303_v30 = vld [vmem:[%s2606_s5 + $0x88] sm:$0xff] }
  0xb7   :  { %v2306_v20 = vld [vmem:[%s2606_s5 + $0xa0] sm:$0xff] }
  0xb8   :  { %1083 = vmatpush.bf16.msrb.mxu2 %v1797_v26  ;;  %1096 = vmatpush.bf16.msrb.mxu3 %v1925_v27  ;;  %v1958_v26 = vld [vmem:[#allocation2 + $0x378] sm:$0xf0]  ;;  %v1561_v27 = vor.u32 %v2167_v17, %v1558_v18 }
  0xb9   :  { %1103 = vmatpush.bf16.msra.mxu0 %v1641_v21  ;;  %1116 = vmatpush.bf16.msra.mxu1 %v1769_v22  ;;  %v1849_v21 = vor.u32 %v2239_v9, %v1846_v12  ;;  %v1977_v22 = vor.u32 %v2271_v13, %v1974_v14  ;;  %v1961_v34 = vor.u32 %v2267_v25, %v1958_v26  ;;  %v2296_v9 = vld [vmem:[%s2606_s5 + $0x50] sm:$0xff]  ;;  %v2295_v13 = vld [vmem:[%s2606_s5 + $0x48] sm:$0xff] }
  0xba   :  { %1059 = vmatmul.bf16.vlgmr.msrb.gmra.mxu0 %v2466_v47  ;;  %1072 = vmatmul.bf16.vlgmr.msrb.gmra.mxu1 %v2468_v48  ;;  %v2308_v12 = vld [vmem:[%s2606_s5 + $0xb0] sm:$0xff]  ;;  %v2307_v14 = vld [vmem:[%s2606_s5 + $0xa8] sm:$0xff] }
  0xbb   :  { %v2304_v25 = vld [vmem:[%s2606_s5 + $0x90] sm:$0xff] }
  0xbc   :  { %1084 = vmatpush.bf16.msrb.mxu2 %v1781_v40  ;;  %1097 = vmatpush.bf16.msrb.mxu3 %v1909_v41  ;;  %v1673_v40 = vor.u32 %v2195_v31, %v1670_v32  ;;  %v2159_v41 = vld [vmem:[#allocation2 + $0xc] sm:$0xf] }
  0xbd   :  { %1104 = vmatpush.bf16.msra.mxu0 %v1625_v37  ;;  %1117 = vmatpush.bf16.msra.mxu1 %v1753_v38  ;;  %v2263_v37 = vld [vmem:[#allocation2 + $0x34c] sm:$0xf]  ;;  %v1942_v38 = vld [vmem:[#allocation2 + $0x358] sm:$0xf0] }
  0xbf   :  { %1085 = vmatmul.bf16.vlgmr.msrb.gmra.mxu2 %v2472_v10  ;;  %1098 = vmatmul.bf16.vlgmr.msrb.gmra.mxu3 %v2474_v11 }
  0xc0   :  { %1129 = vmatpush.bf16.msra.mxu2 %v1897_v45  ;;  %1142 = vmatpush.bf16.msra.mxu3 %v2025_v46  ;;  %v1817_v45 = vor.u32 %v2231_v35, %v1814_v36  ;;  %v1945_v46 = vor.u32 %v2263_v37, %v1942_v38  ;;  %v2302_v35 = vld [vmem:[%s2606_s5 + $0x80] sm:$0xff]  ;;  %v2317_v36 = vld [vmem:[%s2606_s5 + $0xf8] sm:$0xff] }
  0xc1   :  { %1105 = vmatpush.bf16.msra.mxu0 %v1609_v53  ;;  %1118 = vmatpush.bf16.msra.mxu1 %v1737_v54  ;;  %v1529_v53 = vor.u32 %v2159_v41, %v1526_v42  ;;  %v1657_v54 = vor.u32 %v2191_v43, %v1654_v44  ;;  %v2316_v41 = vld [vmem:[%s2606_s5 + $0xf0] sm:$0xff]  ;;  %v2315_v43 = vld [vmem:[%s2606_s5 + $0xe8] sm:$0xff] }
  0xc4   :  { %1130 = vmatpush.bf16.msra.mxu2 %v1881_v59  ;;  %1143 = vmatpush.bf16.msra.mxu3 %v2009_v60  ;;  %v1782_v59 = vld [vmem:[#allocation2 + $0x218] sm:$0xf0]  ;;  %v2255_v60 = vld [vmem:[#allocation2 + $0x30c] sm:$0xf] }
  0xc5   :  { %1106 = vmatpush.bf16.msra.mxu0 %v1593_v1  ;;  %1119 = vmatpush.bf16.msra.mxu1 %v1721_v2  ;;  %v1785_v63 = vor.u32 %v2223_v58, %v1782_v59  ;;  %v1913_v0 = vor.u32 %v2255_v60, %v1910_v61  ;;  %v2291_v1 = vld [vmem:[%s2606_s5 + $0x28] sm:$0xff]  ;;  %v2290_v2 = vld [vmem:[%s2606_s5 + $0x20] sm:$0xff] }
  0xc8   :  { %1131 = vmatpush.bf16.msra.mxu2 %v1865_v7  ;;  %1144 = vmatpush.bf16.msra.mxu3 %v1993_v8  ;;  %v2297_v7 = vld [vmem:[%s2606_s5 + $0x58] sm:$0xff] }
  0xc9   :  { %1107 = vmatpush.bf16.msra.mxu0 %v1577_v15  ;;  %1120 = vmatpush.bf16.msra.mxu1 %v1705_v16  ;;  %v2309_v8 = vld [vmem:[%s2606_s5 + $0xb8] sm:$0xff]  ;;  %v2547_v15 = vld [vmem:[%s2605_s4] sm:$0xf]  ;;  %s1484_s4 = sshll.u32 %s2608_s7, 4  ;;  %s1485_s4 = int_to_ptr.hbm [resolvable:$true] %s1484_s4 }
  0xca   :  { %v299_v18 = vperm.slane %v2547_v15, 0  ;;  %v300_v38 = vperm.slane %v2547_v15, 1  ;;  %v301_v59 = vperm.slane %v2547_v15, 2 }
  0xcc   :  { %1132 = vmatpush.bf16.msra.mxu2 %v1849_v21  ;;  %1145 = vmatpush.bf16.msra.mxu3 %v1977_v22  ;;  %v2305_v22 = vld [vmem:[%s2606_s5 + $0x98] sm:$0xff] }
  0xcd   :  { %1108 = vmatpush.bf16.msra.mxu0 %v1561_v27  ;;  %1121 = vmatpush.bf16.msra.mxu1 %v1689_v28 }
  0xd0   :  { %1133 = vmatpush.bf16.msra.mxu2 %v1833_v33  ;;  %1146 = vmatpush.bf16.msra.mxu3 %v1961_v34 }
  0xd1   :  { %1109 = vmatpush.bf16.msra.mxu0 %v1545_v39  ;;  %1122 = vmatpush.bf16.msra.mxu1 %v1673_v40 }
  0xd4   :  { %1134 = vmatpush.bf16.msra.mxu2 %v1817_v45  ;;  %1147 = vmatpush.bf16.msra.mxu3 %v1945_v46 }
  0xd5   :  { %1110 = vmatpush.bf16.msra.mxu0 %v1529_v53  ;;  %1123 = vmatpush.bf16.msra.mxu1 %v1657_v54 }
  0xd8   :  { %1135 = vmatpush.bf16.msra.mxu2 %v1801_v56  ;;  %1148 = vmatpush.bf16.msra.mxu3 %v1929_v57  ;;  %v2313_v56 = vld [vmem:[%s2606_s5 + $0xd8] sm:$0xff] }
  0xd9   :  { %1423 = vmatpush.bf16.msrb.mxu0 %v2293_v55  ;;  %1124 = vmatmul.bf16.vlgmr.msra.gmra.mxu1 %v2468_v48  ;;  %v2289_v48 = vld [vmem:[%s2606_s5 + $0x18] sm:$0xff] }
  0xda   :  { %1111 = vmatmul.bf16.vlgmr.msra.gmra.mxu0 %v2466_v47  ;;  %v2301_v47 = vld [vmem:[%s2606_s5 + $0x78] sm:$0xff] }
  0xdb   :  { %1436 = vmatpush.bf16.msrb.mxu1 %v2301_v47 }
  0xdc   :  { %1136 = vmatpush.bf16.msra.mxu2 %v1785_v63  ;;  %1149 = vmatpush.bf16.msra.mxu3 %v1913_v0 }
  0xdd   :  { %1424 = vmatpush.bf16.msrb.mxu0 %v2292_v62  ;;  %v2312_v62 = vld [vmem:[%s2606_s5 + $0xd0] sm:$0xff] }
  0xdf   :  { %1137 = vmatmul.bf16.vlgmr.msra.gmra.mxu2 %v2472_v10  ;;  %1150 = vmatmul.bf16.vlgmr.msra.gmra.mxu3 %v2474_v11  ;;  %v2288_v10 = vld [vmem:[%s2606_s5 + $0x10] sm:$0xff] }
  0xe0   :  { %v2300_v11 = vld [vmem:[%s2606_s5 + $0x70] sm:$0xff]  ;;  %1449 = vmatpush.bf16.msrb.mxu2 %v2309_v8  ;;  %1462 = vmatpush.bf16.msrb.mxu3 %v2317_v36 }
  0xe1   :  { %1425 = vmatpush.bf16.msrb.mxu0 %v2291_v1  ;;  %1437 = vmatpush.bf16.msrb.mxu1 %v2300_v11  ;;  %v2310_v11 = vld [vmem:[%s2606_s5 + $0xc0] sm:$0xff] }
  0xe4   :  { %1450 = vmatpush.bf16.msrb.mxu2 %v2308_v12  ;;  %1463 = vmatpush.bf16.msrb.mxu3 %v2316_v41 }
  0xe5   :  { %1426 = vmatpush.bf16.msrb.mxu0 %v2290_v2  ;;  %1438 = vmatpush.bf16.msrb.mxu1 %v2299_v4  ;;  %v2311_v2 = vld [vmem:[%s2606_s5 + $0xc8] sm:$0xff] }
  0xe8   :  { %1451 = vmatpush.bf16.msrb.mxu2 %v2307_v14  ;;  %1464 = vmatpush.bf16.msrb.mxu3 %v2315_v43 }
  0xe9   :  { %1427 = vmatpush.bf16.msrb.mxu0 %v2289_v48  ;;  %1439 = vmatpush.bf16.msrb.mxu1 %v2298_v6 }
  0xec   :  { %1452 = vmatpush.bf16.msrb.mxu2 %v2306_v20  ;;  %1465 = vmatpush.bf16.msrb.mxu3 %v2314_v52 }
  0xed   :  { %1428 = vmatpush.bf16.msrb.mxu0 %v2288_v10  ;;  %1440 = vmatpush.bf16.msrb.mxu1 %v2297_v7 }
  0xf0   :  { %1453 = vmatpush.bf16.msrb.mxu2 %v2305_v22  ;;  %1466 = vmatpush.bf16.msrb.mxu3 %v2313_v56 }
  0xf1   :  { %1429 = vmatpush.bf16.msrb.mxu0 %v2287_v3  ;;  %1441 = vmatpush.bf16.msrb.mxu1 %v2296_v9 }
  0xf4   :  { %1454 = vmatpush.bf16.msrb.mxu2 %v2304_v25  ;;  %1467 = vmatpush.bf16.msrb.mxu3 %v2312_v62 }
  0xf5   :  { %1430 = vmatpush.bf16.msrb.mxu0 %v2286_v5  ;;  %1442 = vmatpush.bf16.msrb.mxu1 %v2295_v13  ;;  %v302_v13 = vperm.slane %v2547_v15, 3  ;;  %v2322_v15 = vld [vmem:[%s2607_s6] ss:$0 sm:$0xff] }
  0xf8   :  { %1455 = vmatpush.bf16.msrb.mxu2 %v2303_v30  ;;  %1468 = vmatpush.bf16.msrb.mxu3 %v2311_v2 }
  0xf9   :  { %1443 = vmatpush.bf16.msrb.mxu1 %v2294_v19 }
  0xfc   :  { %1456 = vmatpush.bf16.msrb.mxu2 %v2302_v35  ;;  %1469 = vmatpush.bf16.msrb.mxu3 %v2310_v11 }
 0x114   :  { %v956_v16 = vpop.f32.mrf.mxu0  ;;  %v969_v17 = vpop.f32.mrf.mxu1 }
 0x115   :  { %v957_v21 = vadd.f32 %v956_v16, %v299_v18 }
 0x117   :  { %v970_v26 = vadd.f32 %v969_v17, %v957_v21 }
 0x11c   :  { %v958_v23 = vpop.f32.mrf.mxu0  ;;  %v971_v24 = vpop.f32.mrf.mxu1 }
 0x122   :  { %v982_v27 = vpop.f32.mrf.mxu2  ;;  %v995_v28 = vpop.f32.mrf.mxu3 }
 0x123   :  { %v983_v29 = vadd.f32 %v982_v27, %v970_v26 }
 0x124   :  { %v1008_v32 = vpop.f32.mrf.mxu0  ;;  %v1021_v33 = vpop.f32.mrf.mxu1 }
 0x125   :  { %v996_v31 = vadd.f32 %v995_v28, %v983_v29  ;;  %v1009_v42 = vadd.f32 %v1008_v32, %v300_v38 }
 0x127   :  { %v1155_v34 = vmax.f32 %v996_v31, 0.0  ;;  %v1022_v46 = vadd.f32 %v1021_v33, %v1009_v42 }
 0x129   :  { %v1159_v37 = vpack.c.bf16 %v1155_v34, %v1155_v34 }
 0x12a   :  { %v984_v39 = vpop.f32.mrf.mxu2  ;;  %v997_v40 = vpop.f32.mrf.mxu3 }
 0x12b   :  { %1431 = vmatmul.bf16.vlgmr.msrb.gmra.mxu0 %v1159_v37 }
 0x12c   :  { %v1010_v44 = vpop.f32.mrf.mxu0  ;;  %v1023_v45 = vpop.f32.mrf.mxu1 }
 0x132   :  { %v1034_v49 = vpop.f32.mrf.mxu2  ;;  %v1047_v50 = vpop.f32.mrf.mxu3 }
 0x133   :  { %v1035_v51 = vadd.f32 %v1034_v49, %v1022_v46 }
 0x135   :  { %v1048_v53 = vadd.f32 %v1047_v50, %v1035_v51 }
 0x137   :  { %v1060_v54 = vpop.f32.mrf.mxu0  ;;  %v1073_v55 = vpop.f32.mrf.mxu1  ;;  %v1156_v57 = vmax.f32 %v1048_v53, 0.0 }
 0x138   :  { %v1061_v63 = vadd.f32 %v1060_v54, %v301_v59 }
 0x139   :  { %v1160_v58 = vpack.c.bf16 %v1156_v57, %v1156_v57 }
 0x13a   :  { %v1036_v60 = vpop.f32.mrf.mxu2  ;;  %v1049_v61 = vpop.f32.mrf.mxu3  ;;  %v1074_v47 = vadd.f32 %v1073_v55, %v1061_v63 }
 0x13b   :  { %1444 = vmatmul.bf16.vlgmr.msrb.gmra.mxu1 %v1160_v58 }
 0x13f   :  { %v1062_v0 = vpop.f32.mrf.mxu0  ;;  %v1075_v1 = vpop.f32.mrf.mxu1 }
 0x142   :  { %v1086_v48 = vpop.f32.mrf.mxu2  ;;  %v1099_v10 = vpop.f32.mrf.mxu3 }
 0x143   :  { %v1087_v3 = vadd.f32 %v1086_v48, %v1074_v47 }
 0x145   :  { %v1100_v4 = vadd.f32 %v1099_v10, %v1087_v3 }
 0x147   :  { %v1157_v5 = vmax.f32 %v1100_v4, 0.0 }
 0x149   :  { %v1161_v6 = vpack.c.bf16 %v1157_v5, %v1157_v5 }
 0x14a   :  { %v1088_v7 = vpop.f32.mrf.mxu2  ;;  %v1101_v8 = vpop.f32.mrf.mxu3 }
 0x14b   :  { %1457 = vmatmul.bf16.vlgmr.msrb.gmra.mxu2 %v1161_v6 }
 0x156   :  { %v1125_v12 = vpop.f32.mrf.mxu1 }
 0x157   :  { %v1112_v9 = vpop.f32.mrf.mxu0 }
 0x158   :  { %v1113_v14 = vadd.f32 %v1112_v9, %v302_v13 }
 0x15a   :  { %v1126_v18 = vadd.f32 %v1125_v12, %v1113_v14 }
 0x15e   :  { %v1127_v17 = vpop.f32.mrf.mxu1 }
 0x15f   :  { %v1114_v16 = vpop.f32.mrf.mxu0 }
 0x162   :  { %v1138_v19 = vpop.f32.mrf.mxu2  ;;  %v1151_v20 = vpop.f32.mrf.mxu3 }
 0x163   :  { %v1139_v21 = vadd.f32 %v1138_v19, %v1126_v18 }
 0x165   :  { %v1152_v22 = vadd.f32 %v1151_v20, %v1139_v21 }
 0x167   :  { %v1158_v23 = vmax.f32 %v1152_v22, 0.0 }
 0x169   :  { %v1162_v24 = vpack.c.bf16 %v1158_v23, %v1158_v23 }
 0x16a   :  { %v1140_v25 = vpop.f32.mrf.mxu2  ;;  %v1153_v26 = vpop.f32.mrf.mxu3 }
 0x16b   :  { %1470 = vmatmul.bf16.vlgmr.msrb.gmra.mxu3 %v1162_v24 }
 0x1a8   :  { %v1432_v27 = vpop.f32.mrf.mxu0 }
 0x1a9   :  { %v1433_v33 = vadd.f32 %v2322_v15, %v1432_v27 }
 0x1b0   :  { %v1434_v28 = vpop.f32.mrf.mxu0 }
 0x1b8   :  { %v1445_v29 = vpop.f32.mrf.mxu1 }
 0x1b9   :  { %v1446_v34 = vadd.f32 %v1445_v29, %v1433_v33 }
 0x1c0   :  { %v1447_v30 = vpop.f32.mrf.mxu1 }
 0x1ce   :  { %v1458_v31 = vpop.f32.mrf.mxu2 }
 0x1cf   :  { %v1459_v35 = vadd.f32 %v1458_v31, %v1446_v34 }
 0x1d6   :  { %v1460_v32 = vpop.f32.mrf.mxu2 }
 0x1ee   :  { %v1471_v36 = vpop.f32.mrf.mxu3 }
 0x1ef   :  { %v1472_v37 = vadd.f32 %v1471_v36, %v1459_v35 }
 0x1f1   :  { %1476 = vst.msk [vmem:[#allocation5] sm:$0xff] %vm1475_vm2, %v1472_v37 }
 0x1f2   :  { %1487 = dma.vmem_to_hbm [thread:$0]  %s1483_s17, 128, %s1485_s4, [#allocation4]  }
 0x1f6   :  { %v1473_v38 = vpop.f32.mrf.mxu3 }
 0x1f7   :  { %2373 = dma.done.wait [#allocation4], 128  }
 0x1f8   :  { %2374 = vsyncadd [#allocation4], 4294967168 }
 0x1f9   :  { %1492 = vsyncpa [#allocation3], 1 }
 0x1fa   :  { %1493 = vsyncpa [#allocation4], 1 }

</bundles_post_ra>
